<compile_context>
chip_gen: v5e
topology: v5e:2x2
jax: 0.10.0
libtpu: 0.0.40
codegen_flags: <defaults>
</compile_context>

<pallas_src>
import jax
import jax.numpy as jnp
from jax.experimental import pallas as pl
from jax.experimental.pallas import tpu as pltpu


def _sse3d_kernel(w_ref, b_ref, x_ref, o_ref):
    # w_ref: (C,) SMEM f32          -- Conv3d(C, 1, 1).weight flattened
    # b_ref: (1,) SMEM f32          -- Conv3d bias
    # x_ref: (C, sub_tile, 128) or (C, s_tile) VMEM (batch dim squeezed)
    # o_ref: same shape/dtype as x_ref
    num_channels = x_ref.shape[0]

    # Load the tile once in the I/O dtype; reused for the reduce and the gate.
    xv = x_ref[...]

    # 1x1x1 conv == per-position weighted channel sum.  Unrolled over the small
    # static channel count; f32 accumulation, full-tile VALU adds.
    acc = jnp.full((1,) + xv.shape[1:], b_ref[0], dtype=jnp.float32)
    for c in range(num_channels):
        acc = acc + w_ref[c] * xv[c:c + 1].astype(jnp.float32)

    # Sigmoid on the EUP; cast the gate to the I/O dtype once per tile so the
    # dominant gating multiply runs at native width (bf16 on v6e/v7x).
    gate = jax.nn.sigmoid(acc).astype(xv.dtype)          # (1, ...) per-position

    # Single dense full-slab store; gate broadcasts over the channel axis.
    o_ref[...] = xv * gate


def spatial_se_layer_3d(x, weight, bias, *, target_block_bytes=2 << 20):
    """
    x:      (B, C, D, H, W)  float32 or bfloat16 (NCDHW, same as PyTorch)
    weight: (1, C, 1, 1, 1)                      (Conv3d(C, 1, 1).weight)
    bias:   (1,)                                 (Conv3d bias)
    returns (B, C, D, H, W), same dtype as x
    """
    B, C, D, H, W = x.shape
    S = D * H * W
    itemsize = jnp.dtype(x.dtype).itemsize

    w_vec = jnp.asarray(weight).reshape(C).astype(jnp.float32)
    b_vec = jnp.asarray(bias).reshape(1).astype(jnp.float32)
    x_flat = x.reshape(B, C, S)

    smem_specs = [
        pl.BlockSpec(memory_space=pltpu.MemorySpace.SMEM),   # weights (C,)
        pl.BlockSpec(memory_space=pltpu.MemorySpace.SMEM),   # bias (1,)
    ]

    if S % 128 == 0:
        # --- dense path: free reshape to (B, C, S/128, 128), (8,128)-dense tiles ---
        s_sub = S // 128
        row_bytes = C * 128 * itemsize
        sub_tile = max(8, (target_block_bytes // row_bytes) // 8 * 8)
        sub_tile = min(sub_tile, s_sub)              # full extent is always legal
        n_tiles = pl.cdiv(s_sub, sub_tile)
        # v7x megacore / pipelining: prefer >= ~4 grid steps when the volume allows.
        if B * n_tiles < 4:
            want = -(-4 // B)
            alt = max(8, (s_sub // want) // 8 * 8)
            if 0 < alt < sub_tile:
                sub_tile = alt
                n_tiles = pl.cdiv(s_sub, sub_tile)

        x_in = x_flat.reshape(B, C, s_sub, 128)
        block = (None, C, sub_tile, 128)
        index_map = lambda b, s: (b, 0, s, 0)
        out_shape = jax.ShapeDtypeStruct((B, C, s_sub, 128), x.dtype)
        block_bytes = C * sub_tile * 128 * itemsize
    else:
        # --- ragged fallback: no wrapper pad / slice; Pallas masks the tail block ---
        s_tile = max(128, (target_block_bytes // (C * itemsize)) // 128 * 128)
        if s_tile >= S:
            s_tile = S                               # full extent (may be unaligned)
        n_tiles = pl.cdiv(S, s_tile)
        x_in = x_flat
        block = (None, C, s_tile)
        index_map = lambda b, s: (b, 0, s)
        out_shape = jax.ShapeDtypeStruct((B, C, S), x.dtype)
        block_bytes = C * s_tile * itemsize

    cost = pl.CostEstimate(
        flops=3 * B * C * S,            # conv mul+add + gating mul
        transcendentals=B * S,          # sigmoid
        bytes_accessed=2 * B * C * S * itemsize,
    )

    out = pl.pallas_call(
        _sse3d_kernel,
        out_shape=out_shape,
        grid_spec=pltpu.PrefetchScalarGridSpec(
            num_scalar_prefetch=0,
            grid=(B, n_tiles),
            in_specs=smem_specs + [pl.BlockSpec(block, index_map)],
            out_specs=pl.BlockSpec(block, index_map),
        ),
        compiler_params=pltpu.CompilerParams(
            dimension_semantics=("parallel", "parallel"),
            # double-buffered in + out blocks + headroom; safely below the v7x
            # 64 MiB physical VMEM and the 16/32 MiB scoped defaults elsewhere.
            vmem_limit_bytes=int(min(48 << 20, max(16 << 20, 6 * block_bytes))),
        ),
        cost_estimate=cost,
    )(w_vec, b_vec, x_in)

    return out.reshape(B, C, D, H, W)


def _reference(x, weight, bias):
    # plain-JAX reference of the PyTorch forward (default path)
    w = weight.reshape(1, -1, 1, 1, 1).astype(jnp.float32)
    conv = jnp.sum(x.astype(jnp.float32) * w, axis=1, keepdims=True)
    conv = conv + bias.reshape(1, 1, 1, 1, 1).astype(jnp.float32)
    gate = jax.nn.sigmoid(conv)
    return (x.astype(jnp.float32) * gate).astype(x.dtype)


if __name__ == "__main__":
    key = jax.random.PRNGKey(0)
    kx, kw, kb, kx2, kw2 = jax.random.split(key, 5)

    # lane-aligned volume -> dense (B, C, S/128, 128) path
    B, C, D, H, W = 2, 4, 8, 8, 8                    # D*H*W = 512
    x = jax.random.normal(kx, (B, C, D, H, W), dtype=jnp.float32)
    weight = jax.random.normal(kw, (1, C, 1, 1, 1), dtype=jnp.float32) * 0.5
    bias = jax.random.normal(kb, (1,), dtype=jnp.float32) * 0.1

    y = jax.block_until_ready(spatial_se_layer_3d(x, weight, bias))
    y_ref = _reference(x, weight, bias)
    assert y.shape == x.shape
    assert jnp.max(jnp.abs(y - y_ref)) < 1e-5

    # non-lane-aligned volume -> ragged fallback path (no pad, no slice)
    B2, C2, D2, H2, W2 = 2, 3, 6, 7, 5               # D*H*W = 210
    x2 = jax.random.normal(kx2, (B2, C2, D2, H2, W2), dtype=jnp.float32)
    w2 = jax.random.normal(kw2, (1, C2, 1, 1, 1), dtype=jnp.float32) * 0.5
    y2 = jax.block_until_ready(spatial_se_layer_3d(x2, w2, bias))
    y2_ref = _reference(x2, w2, bias)
    assert y2.shape == x2.shape
    assert jnp.max(jnp.abs(y2 - y2_ref)) < 1e-5

    print("KERNEL_OK")
</pallas_src>

<mosaic_0001>
module attributes {stable_mosaic.version = 11 : i64} {
  func.func @_sse3d_kernel(%arg0: i32, %arg1: i32, %arg2: memref<4xf32, #tpu.memory_space<smem>>, %arg3: memref<1xf32, #tpu.memory_space<smem>>, %arg4: memref<1x4x4x128xf32, #tpu.memory_space<vmem>>, %arg5: memref<1x4x4x128xf32, #tpu.memory_space<vmem>>) attributes {dimension_semantics = [#tpu.dimension_semantics<parallel>, #tpu.dimension_semantics<parallel>], iteration_bounds = array<i64: 2, 1>, scalar_prefetch = 0 : i64, scratch_operands = 0 : i64, tpu.core_type = #tpu.core_type<tc>, window_params = [{transform_indices = @transform_0, window_bounds = array<i64: 4>}, {transform_indices = @transform_1, window_bounds = array<i64: 1>}, {transform_indices = @transform_2, window_bounds = array<i64: 1, 4, 4, 128>}, {transform_indices = @transform_3, window_bounds = array<i64: 1, 4, 4, 128>}]} {
    %c0 = arith.constant 0 : index
    %c0_0 = arith.constant 0 : index
    %c0_1 = arith.constant 0 : index
    %c0_2 = arith.constant 0 : index
    %0 = vector.load %arg4[%c0, %c0_0, %c0_1, %c0_2] : memref<1x4x4x128xf32, #tpu.memory_space<vmem>>, vector<1x4x4x128xf32>
    %1 = vector.shape_cast %0 : vector<1x4x4x128xf32> to vector<4x4x128xf32>
    %c0_3 = arith.constant 0 : index
    %2 = memref.load %arg3[%c0_3] : memref<1xf32, #tpu.memory_space<smem>>
    %3 = vector.broadcast %2 : f32 to vector<1x4x128xf32>
    %c0_4 = arith.constant 0 : index
    %4 = memref.load %arg2[%c0_4] : memref<4xf32, #tpu.memory_space<smem>>
    %5 = vector.extract_strided_slice %1 {offsets = [0, 0, 0], sizes = [1, 4, 128], strides = [1, 1, 1]} : vector<4x4x128xf32> to vector<1x4x128xf32>
    %6 = vector.broadcast %4 : f32 to vector<1x4x128xf32>
    %7 = arith.mulf %6, %5 : vector<1x4x128xf32>
    %8 = arith.addf %3, %7 : vector<1x4x128xf32>
    %c1 = arith.constant 1 : index
    %9 = memref.load %arg2[%c1] : memref<4xf32, #tpu.memory_space<smem>>
    %10 = vector.extract_strided_slice %1 {offsets = [1, 0, 0], sizes = [1, 4, 128], strides = [1, 1, 1]} : vector<4x4x128xf32> to vector<1x4x128xf32>
    %11 = vector.broadcast %9 : f32 to vector<1x4x128xf32>
    %12 = arith.mulf %11, %10 : vector<1x4x128xf32>
    %13 = arith.addf %8, %12 : vector<1x4x128xf32>
    %c2 = arith.constant 2 : index
    %14 = memref.load %arg2[%c2] : memref<4xf32, #tpu.memory_space<smem>>
    %15 = vector.extract_strided_slice %1 {offsets = [2, 0, 0], sizes = [1, 4, 128], strides = [1, 1, 1]} : vector<4x4x128xf32> to vector<1x4x128xf32>
    %16 = vector.broadcast %14 : f32 to vector<1x4x128xf32>
    %17 = arith.mulf %16, %15 : vector<1x4x128xf32>
    %18 = arith.addf %13, %17 : vector<1x4x128xf32>
    %c3 = arith.constant 3 : index
    %19 = memref.load %arg2[%c3] : memref<4xf32, #tpu.memory_space<smem>>
    %20 = vector.extract_strided_slice %1 {offsets = [3, 0, 0], sizes = [1, 4, 128], strides = [1, 1, 1]} : vector<4x4x128xf32> to vector<1x4x128xf32>
    %21 = vector.broadcast %19 : f32 to vector<1x4x128xf32>
    %22 = arith.mulf %21, %20 : vector<1x4x128xf32>
    %23 = arith.addf %18, %22 : vector<1x4x128xf32>
    %24 = arith.negf %23 : vector<1x4x128xf32>
    %25 = math.exp %24 : vector<1x4x128xf32>
    %cst = arith.constant 1.000000e+00 : f32
    %26 = vector.broadcast %cst : f32 to vector<1x4x128xf32>
    %27 = arith.addf %26, %25 : vector<1x4x128xf32>
    %28 = arith.divf %26, %27 : vector<1x4x128xf32>
    %29 = vector.broadcast %28 : vector<1x4x128xf32> to vector<4x4x128xf32>
    %30 = arith.mulf %1, %29 : vector<4x4x128xf32>
    %c0_5 = arith.constant 0 : index
    %c0_6 = arith.constant 0 : index
    %c0_7 = arith.constant 0 : index
    %c0_8 = arith.constant 0 : index
    %31 = vector.load %arg5[%c0_5, %c0_6, %c0_7, %c0_8] : memref<1x4x4x128xf32, #tpu.memory_space<vmem>>, vector<1x4x4x128xf32>
    %32 = vector.shape_cast %31 : vector<1x4x4x128xf32> to vector<4x4x128xf32>
    %33 = vector.shape_cast %30 : vector<4x4x128xf32> to vector<1x4x4x128xf32>
    tpu.vector_store %arg5[%c0_5, %c0_6, %c0_7, %c0_8], %33 {strides = array<i32>} : memref<1x4x4x128xf32, #tpu.memory_space<vmem>>, vector<1x4x4x128xf32>,
    return
  }
  func.func @transform_0(%arg0: i32, %arg1: i32) -> i32 {
    %c0_i32 = arith.constant 0 : i32
    %c0_i32_0 = arith.constant 0 : i32
    return %c0_i32 : i32
  }
  func.func @transform_1(%arg0: i32, %arg1: i32) -> i32 {
    %c0_i32 = arith.constant 0 : i32
    %c0_i32_0 = arith.constant 0 : i32
    return %c0_i32 : i32
  }
  func.func @transform_2(%arg0: i32, %arg1: i32) -> (i32, i32, i32, i32) {
    %c0_i32 = arith.constant 0 : i32
    %c0_i32_0 = arith.constant 0 : i32
    %c0_i32_1 = arith.constant 0 : i32
    return %arg0, %c0_i32, %arg1, %c0_i32_0 : i32, i32, i32, i32
  }
  func.func @transform_3(%arg0: i32, %arg1: i32) -> (i32, i32, i32, i32) {
    %c0_i32 = arith.constant 0 : i32
    %c0_i32_0 = arith.constant 0 : i32
    %c0_i32_1 = arith.constant 0 : i32
    return %arg0, %c0_i32, %arg1, %c0_i32_0 : i32, i32, i32, i32
  }
}

</mosaic_0001>

<bundles_post_ra>
// kernel: tpu_custom_call.1
= control target key start
LH: loop header
LB: loop body
LE: loop exit
PB: predicated region body
PF: predicated region fallthrough
CT: control target
= control target key end

     0   :  { %s806_s0 = inlined_call_operand.vmem [shape: f32[4], index: 0, kind: input, shape index: {}]   ;;  %s807_s1 = inlined_call_operand.<no memory space> [shape: f32[1], index: 1, kind: input, shape index: {}]   ;;  %s808_s2 = inlined_call_operand.hbm [shape: f32[2,4,4,128], index: 2, kind: input, shape index: {}]   ;;  %s809_s3 = inlined_call_operand.hbm [shape: f32[2,4,4,128], index: 3, kind: output, shape index: {}]  }
   0x1   :  { %8 = sst [smem:[#allocation2]] %s807_s1 }
   0x2   :  { %9 = vsyncpa [#allocation6], 0 }
   0x3   :  { %10 = vsyncpa [#allocation4], 0 }
   0x4   :  { %12 = vsyncpa [#allocation4 + $0x1], 0 }
   0x5   :  { %13 = vsyncpa [#allocation5], 0 }
   0x6   :  { %15 = vsyncpa [#allocation5 + $0x1], 0  ;;  %s651_s14 = smov 0   ;;  %s653_s15 = smov 0  }
   0x7   :  { %s655_s16 = smov 0   ;;  %s657_s17 = smov 0  }
   0x8   :  { %s659_s18 = smov 0   ;;  %s661_s19 = smov 0  }
   0x9 LB: > { %s386_s1 = sadd.s32 4294967295, %s621_s19   ;;  %s387_s20 = sadd.s32 4294967294, %s621_s19   ;;  %s621_s19 = sphi %s661_s19, %s21_s19   ;;  %s617_s18 = sphi %s659_s18, %s821_s18   ;;  %s613_s17 = sphi %s657_s17, %s820_s17   ;;  %s609_s16 = sphi %s655_s16, %s819_s16   ;;  %s605_s15 = sphi %s653_s15, %s818_s15   ;;  %s601_s14 = sphi %s651_s14, %s817_s14  }
   0xa   : > { %s84_s21 = sadd.s32 1, %s609_s16  ;;  %p91_p0 = scmp.ne.s32.totalorder %s609_s16, %s605_s15 }
   0xb   : > { %p92_p1 = scmp.eq.s32.totalorder %s621_s19, 0  ;;  %p97_p2 = scmp.ne.s32.totalorder %s605_s15, %s601_s14 }
   0xc   : > { %p689_p3 = scmp.eq.s32.totalorder %s386_s1, 0  ;;  %p123_p4 = scmp.eq.s32.totalorder %s386_s1, 1 }
   0xd   : > { %p693_p5 = por %p92_p1, %p91_p0  ;;  %p129_p6 = scmp.eq.s32.totalorder %s387_s20, 1 }
   0xe   : > { %p699_p7 = por %p689_p3, %p97_p2  ;;  %p703_p8 = por %p123_p4, %p91_p0 }
   0xf   : > { %p707_p9 = por %p129_p6, %p97_p2  ;;  %p388_p10 = scmp.ge.s32.totalorder %s621_s19, 1 }
  0x10   : > { %p136_p11 = scmp.lt.s32.totalorder %s621_s19, 3  ;;  %s148_s29 = sshll.u32 %s806_s0, 4  ;;  %s149_s29 = int_to_ptr.vmem [resolvable:$true] %s148_s29 }
  0x11   : > { %p390_p13 = scmp.ge.s32.totalorder %s621_s19, 2  ;;  %p430_p0 = scmp.lt.s32.totalorder %s621_s19, 2 }
  0x12   : > { %p716_p12 = pnand %p388_p10, %p136_p11  ;;  %s33_s5 = sadd.s32 1, %s617_s18 }
  0x13   : > { %p726_p2 = pnand %p430_p0, %p693_p5  ;;  %p35_p6 = scmp.ge.s32.totalorder %s33_s5, 2 }
  0x14   : > { %p417_p1 = pneg %p716_p12  ;;  %s162_s6 = sand.u32 1, %s609_s16  }
  0x15   : > { %s623_s7 = smov [#allocation3]   ;;  %s823_s5 = smov (%p35_p6, %s33_s5), 0 }
  0x16   : > { %p418_p4 = pnand %p417_p1, %p689_p3  ;;  %s391_s8 = sshll.u32 %s162_s6, 4 }
  0x17   : > { %s79_s9 = ssub.s32 %s617_s18, %s823_s5  ;;  %s407_s10 = sshll.u32 %s617_s18, 4 }
  0x18   : > { %420 = dma.vmem_to_smem (!%p418_p4), %s149_s29, 16, %s623_s7, [#allocation6]  }
  0x19   : > { %p82_p10 = scmp.eq.s32.totalorder %s79_s9, 0  ;;  %s172_s13 = scalar_lea.hbm %s808_s2, %s407_s10 }
  0x1a   : > { %s166_s1 = scalar_lea.vmem [#allocation7], %s391_s8  ;;  %s173_s27 = sshll.u32 %s172_s13, 4  ;;  %s174_s27 = int_to_ptr.hbm [resolvable:$true] %s173_s27 }
  0x1b   : > { %s175_s20 = sshll.u32 %s166_s1, 4  ;;  %s163_s28 = scalar_lea.sflag [#allocation4], %s162_s6  ;;  %s176_s20 = int_to_ptr.vmem [resolvable:$true] %s175_s20 }
  0x1c   : > { %s745_s23 = scalar_select %p82_p10, %s609_s16, %s84_s21  }
  0x1d   : > { %s624_s29 = smov 64   ;;  %s625_s7 = smov 4  }
  0x1e   : > { %424 = dma.hbm_to_vmem [thread:$0]  (!%p726_p2), %s174_s27, 256, %s176_s20, %s163_s28, %s624_s29, %s624_s29, %s625_s7  }
  0x1f   : > { %187 = sbr.rel (%p716_p12) target bundleno = 98 (0x62), region = 32 }
  0x24   : > { %588 = dma.done.wait (%p689_p3), [#allocation6], 16  }
  0x25   : > { %590 = vsyncadd (%p689_p3), [#allocation6], 4294967280  ;;  %s756_s21 = sand.u32 1, %s605_s15  }
  0x26   : > { %s396_s6 = sshll.u32 %s756_s21, 4  ;;  %s195_s8 = scalar_lea.sflag [#allocation4], %s756_s21 }
  0x27   : > { %s198_s4 = scalar_lea.vmem [#allocation7], %s396_s6 }
  0x28   : > { %592 = dma.done.wait (%p699_p7), %s195_s8, 256  }
  0x29   : > { %594 = vsyncadd (%p699_p7), %s195_s8, 4294967040 }
  0x2a   : > { %204 = sfence }
  0x2b   : > { %s227_s30 = sld [smem:[#allocation2]]  ;;  %v223_v0 = vld [vmem:[%s198_s4] sm:$0xf]  ;;  %v224_v1 = vld [vmem:[%s198_s4 + $0x4] sm:$0xf]  ;;  %s408_s24 = sshll.u32 %s613_s17, 4 }
  0x2c   : > { %s229_s22 = sld [smem:[#allocation3]]  ;;  %v225_v2 = vld [vmem:[%s198_s4 + $0x8] sm:$0xf]  ;;  %v226_v7 = vld [vmem:[%s198_s4 + $0xc] sm:$0xf]  ;;  %s285_s1 = scalar_lea.hbm %s809_s3, %s408_s24 }
  0x2d   : > { %s398_s9 = sld [smem:[#allocation3 + $0x1]]  ;;  %s222_s20 = scalar_lea.vmem [#allocation8], %s396_s6 }
  0x2e   : > { %s399_s10 = sld [smem:[#allocation3 + $0x2]]  ;;  %s286_s27 = sshll.u32 %s222_s20, 4  ;;  %s287_s27 = int_to_ptr.vmem [resolvable:$true] %s286_s27 }
  0x2f   : > { %s400_s11 = sld [smem:[#allocation3 + $0x3]]  ;;  %s288_s28 = sshll.u32 %s285_s1, 4  ;;  %s289_s28 = int_to_ptr.hbm [resolvable:$true] %s288_s28 }
  0x30   : > { %s273_s17 = scalar_lea.sflag [#allocation5], %s756_s21  ;;  %s549_s29 = sshra.s32 %s289_s28, 4  ;;  %s550_s29 = int_to_ptr.hbm [resolvable:$true] %s549_s29 }
  0x31   : > { %v228_v3 = vstv %s227_s30  ;;  %s551_s7 = scalar_lea.hbm %s550_s29, 16  ;;  %s555_s4 = scalar_lea.hbm %s809_s3, 32 }
  0x32   : > { %v230_v4 = vstv %s229_s22  ;;  %p552_p3 = scmp.ne.s32.totalorder %s550_s29, %s551_s7  ;;  %p556_p11 = scmp.lt.s32.totalorder %s550_s29, %s809_s3 }
  0x33   : > { %v231_v5 = vmul.f32 %v230_v4, %v223_v0  ;;  %v234_v6 = vstv %s398_s9  ;;  %p557_p12 = scmp.lt.s32.totalorder %s555_s4, %s551_s7 }
  0x34   : > { %v235_v8 = vmul.f32 %v234_v6, %v224_v1  ;;  %v238_v9 = vstv %s399_s10  ;;  %p553_p5 = pnand %p552_p3, %p703_p8 }
  0x35   : > { %v232_v10 = vadd.f32 %v231_v5, %v228_v3  ;;  %v239_v11 = vmul.f32 %v238_v9, %v225_v2  ;;  %v242_v12 = vstv %s400_s11  ;;  %p558_p0 = por %p557_p12, %p556_p11 }
  0x36   : > { %v243_v14 = vmul.f32 %v242_v12, %v226_v7  ;;  %p554_p7 = pneg %p553_p5 }
  0x37   : > { %v236_v13 = vadd.f32 %v235_v8, %v232_v10 }
  0x38   : > { %p559_p1 = pnand %p558_p0, %p554_p7 }
  0x39   : > { %v240_v15 = vadd.f32 %v239_v11, %v236_v13 }
  0x3b   : > { %v244_v16 = vadd.f32 %v243_v14, %v240_v15 }
  0x3d   : > { %v401_v17 = vmul.f32 -1.442695, %v244_v16 }
  0x3f   : > { %486 = vpow2.f32 %v401_v17 }
  0x45   : > { %v487_v18 = vpop.eup %486 }
  0x46   : > { %v248_v19 = vadd.f32 1.0, %v487_v18 }
  0x48   : > { %488 = vrcp.f32 %v248_v19  ;;  %v260_v22 = vand.u32 2147483648, %v248_v19  ;;  %vm254_vm0 = vweird.f32 %v248_v19  ;;  %v258_v24 = vand.u32 2147483647, %v248_v19 }
  0x4a   : > { %v261_v26 = vor.u32 1.1754944e-38, %v260_v22  ;;  %vm259_vm3 = vcmp.eq.f32.partialorder %v258_v24, 8.507059e+37 }
  0x4e   : > { %v489_v20 = vpop.eup %488 }
  0x4f   : > { %v250_v21 = vmul.f32 %v489_v20, %v248_v19  ;;  %vm255_vm1 = vweird.f32 %v489_v20 }
  0x50   : > { %vm256_vm2 = vmor %vm254_vm0, %vm255_vm1 }
  0x51   : > { %v251_v23 = vsub.f32 1.0, %v250_v21 }
  0x53   : > { %v252_v25 = vmul.f32 %v489_v20, %v251_v23 }
  0x55   : > { %v253_v27 = vadd.f32 %v489_v20, %v252_v25 }
  0x57   : > { %v257_v28 = vsel %vm256_vm2, %v489_v20, %v253_v27 }
  0x58   : > { %v262_v29 = vsel %vm259_vm3, %v261_v26, %v257_v28 }
  0x59   : > { %v264_v30 = vmul.f32 %v262_v29, %v223_v0  ;;  %v265_v31 = vmul.f32 %v262_v29, %v224_v1  ;;  %v266_v32 = vmul.f32 %v262_v29, %v225_v2  ;;  %v267_v33 = vmul.f32 %v262_v29, %v226_v7 }
  0x5b   : > { %268 = vst [vmem:[%s222_s20] sm:$0xf] %v264_v30 }
  0x5c   : > { %269 = vst [vmem:[%s222_s20 + $0x4] sm:$0xf] %v265_v31 }
  0x5d   : > { %270 = vst [vmem:[%s222_s20 + $0x8] sm:$0xf] %v266_v32 }
  0x5e   : > { %271 = vst [vmem:[%s222_s20 + $0xc] sm:$0xf] %v267_v33 }
  0x5f   : > { %562 = shalt.err (!%p559_p1)
}
  0x60   : > { %s626_s21 = smov 64   ;;  %s627_s9 = smov 4  }
  0x61   : > { %415 = dma.vmem_to_hbm [thread:$0]  (%p703_p8), %s287_s27, 256, %s289_s28, %s273_s17, %s626_s21, %s626_s21, %s627_s9  }
  0x62 PF: > { %s303_s10 = sand.u32 1, %s601_s14   ;;  %p426_p2 = pnand %p390_p13, %p707_p9 }
  0x63   : > { %s304_s11 = scalar_lea.sflag [#allocation5], %s303_s10 }
  0x64   : > { %p427_p4 = pneg %p426_p2 }
  0x66   : > { %596 = dma.done.wait (%p427_p4), %s304_s11, 256  }
  0x67   : > { %598 = vsyncadd (%p427_p4), %s304_s11, 4294967040  ;;  %s21_s19 = sadd.s32 1, %s621_s19   ;;  %s817_s14 = smov %s605_s15 }
  0x68   : > { %p18_p6 = scmp.ge.s32.totalorder %s21_s19, 4   ;;  %s818_s15 = smov %s609_s16 }
  0x69   : > { %s819_s16 = smov %s745_s23  ;;  %s820_s17 = smov %s617_s18 }
  0x6a   : > { %s821_s18 = smov %s823_s5  ;;  %20 = sbr.rel (!%p18_p6) target bundleno = 9 (0x9), region = 82 }
  0x6f   :  { %310 = vsyncpa [#allocation4], 1 }
  0x70   :  { %312 = vsyncpa [#allocation4 + $0x1], 1 }
  0x71   :  { %313 = vsyncpa [#allocation5], 1 }
  0x72   :  { %315 = vsyncpa [#allocation5 + $0x1], 1 }
  0x73   :  { %316 = vsyncpa [#allocation6], 1 }
  0x74   :  { %318 = vsyncpa [#allocation6 + $0x1], 1 }

</bundles_post_ra>
